<compile_context>
chip_gen: v7x
topology: tpu7x:2x2x1
jax: 0.10.0
libtpu: 0.0.40
codegen_flags: <defaults>
</compile_context>

<pallas_src>
import math

import jax
import jax.numpy as jnp
from jax.experimental import pallas as pl
from jax.experimental.pallas import tpu as pltpu

_LANE = 128   # vreg lane width
_SUB = 16     # bf16 sublane packing granularity


def _round_up(x, m):
    return (x + m - 1) // m * m


def _choose_batch_tiling(B, batch_tile):
    """Pick (batch tile Bt, padded batch Bp).

    The Q head is written as a lane-dense (1, Bt) block of a (1, Bp) output,
    so Bt must be a multiple of 128 unless the grid is a single step (block ==
    full array).  For B > 128 we also guarantee >= 2 grid steps so the
    "parallel" batch axis can shard across v7x's two TensorCores.
    """
    if B <= _LANE:
        bt = _round_up(B, _SUB)          # single step, block == full array
        return bt, bt
    bt = _round_up(min(batch_tile, _round_up(B, _LANE)), _LANE)
    bp = _round_up(B, bt)
    if bp // bt < 2:
        bt = max(_LANE, _round_up(bt // 2, _LANE))
        bp = _round_up(B, bt)
    return bt, bp


# ----------------------------------------------------------------------------
# Pallas kernel: fused 3-layer MLP (concat -> Linear+ReLU -> Linear+ReLU -> head)
# ----------------------------------------------------------------------------
def _make_critic_kernel(sd, ad):
    def kernel(s_ref, a_ref, w1_ref, b1_ref, w2_ref, b2_ref, w3_ref, b3_ref,
               o_ref, x_ref):
        # Fused concat: copy the state/action tiles side by side into a VMEM
        # scratch so layer 1 is ONE MXU matmul (one weight-push chain) instead
        # of two tiny-K matmuls.  Copies are vst/vld, off the MXU slot.
        x_ref[:, 0:sd] = s_ref[...]
        x_ref[:, sd:sd + ad] = a_ref[...]

        # Layer 1: bf16 MXU matmul, f32 accumulate, bias + ReLU in f32 (VPU).
        h1 = jnp.dot(x_ref[...], w1_ref[...], preferred_element_type=jnp.float32)
        h1 = jnp.maximum(h1 + b1_ref[...], 0.0)

        # Layer 2.
        h2 = jnp.dot(h1.astype(jnp.bfloat16), w2_ref[...],
                     preferred_element_type=jnp.float32)
        h2 = jnp.maximum(h2 + b2_ref[...], 0.0)

        # Scalar Q head, lane-dense: (1,F) . (Bt,F)^T -> (1, Bt) row so the
        # output store is a full-lane vst rather than Bt masked 1-lane stores.
        # b3 is a scalar read from SMEM.
        q = jnp.einsum("of,bf->ob", w3_ref[...], h2,
                       preferred_element_type=jnp.float32)
        o_ref[...] = (q + b3_ref[0]).astype(o_ref.dtype)

    return kernel


# Flipped to False (once) if this jax/libtpu build rejects single-buffered
# resident weights (pl.Buffered(1)); everything else stays identical.
_WEIGHT_SINGLE_BUFFER = True


# ----------------------------------------------------------------------------
# One-time parameter preparation (do NOT call per forward)
# ----------------------------------------------------------------------------
def prepare_params(params):
    """Casts matmul weights to bf16 (accumulation stays f32 in-kernel),
    reshapes biases to row vectors, and lays the scalar Q head out as a
    lane-dense (1, F) f32 row plus an SMEM scalar bias."""
    w1, b1, w2, b2, w3, b3 = params
    F = w1.shape[1]
    assert w3.shape[-1] == 1, "CriticNetwork has a scalar Q head"
    # TODO(synk): general n_out > 1 head (not needed for CriticNetwork).
    return (
        w1.astype(jnp.bfloat16),                        # (sd+ad, F)
        jnp.reshape(b1, (1, F)).astype(jnp.float32),
        w2.astype(jnp.bfloat16),                        # (F, F)
        jnp.reshape(b2, (1, F)).astype(jnp.float32),
        jnp.reshape(w3, (1, F)).astype(jnp.float32),    # head row (kept f32)
        jnp.reshape(b3, (1,)).astype(jnp.float32),      # SMEM scalar
    )


# ----------------------------------------------------------------------------
# Wrapper
# ----------------------------------------------------------------------------
def critic_forward(state, action, prepared_params, *, batch_tile=512):
    """Pallas-backed forward pass of CriticNetwork.

    state:  (B, state_dim)  float
    action: (B, action_dim) float
    prepared_params: output of prepare_params(...)
    returns torch.squeeze(q)-equivalent: shape (B,) (0-d scalar if B == 1)
    """
    global _WEIGHT_SINGLE_BUFFER
    w1, b1, w2, b2, w3row, b3 = prepared_params
    n_in, F = w1.shape
    B, sd = state.shape
    ad = action.shape[1]
    assert sd + ad == n_in

    # Activations go to bf16 for the MXU; accumulation is f32 in-kernel.
    state = state.astype(jnp.bfloat16)
    action = action.astype(jnp.bfloat16)

    Bt, Bp = _choose_batch_tiling(B, batch_tile)
    if Bp != B:
        # NOTE: choose B as a multiple of Bt to skip this pad copy entirely.
        state = jnp.pad(state, ((0, Bp - B), (0, 0)))
        action = jnp.pad(action, ((0, Bp - B), (0, 0)))

    # Explicit scoped-VMEM limit from the actual footprint (conservatively
    # assuming double-buffered weights) so large F never silently
    # de-pipelines or OOMs under the 16/32 MiB defaults.
    weights_b = (n_in * F + F * F) * 2 + 3 * F * 4           # bf16 mats + f32 rows
    acts_b = 2 * (Bt * (sd + ad) * 2 + Bt * 4)               # double-buffered tiles
    scratch_b = Bt * n_in * 2 + 2 * Bt * F * 4               # concat + h1/h2 temps
    footprint = 2 * weights_b + acts_b + scratch_b
    vmem_limit = int(min(max(2 * footprint + (8 << 20), 32 << 20), 64 << 20))

    grid = (Bp // Bt,)
    out_shape = jax.ShapeDtypeStruct((1, Bp), jnp.float32)

    def run(single_buffer):
        def weight_spec(shape):
            index_map = lambda i: (0,) * len(shape)
            if single_buffer:
                # Constant index_map -> block stays VMEM-resident; one buffer
                # suffices (halves resident-weight VMEM vs. the default 2).
                return pl.BlockSpec(shape, index_map,
                                    pipeline_mode=pl.Buffered(1))
            return pl.BlockSpec(shape, index_map)

        return pl.pallas_call(
            _make_critic_kernel(sd, ad),
            out_shape=out_shape,
            grid=grid,
            in_specs=[
                pl.BlockSpec((Bt, sd), lambda i: (i, 0)),   # state tile
                pl.BlockSpec((Bt, ad), lambda i: (i, 0)),   # action tile
                weight_spec((n_in, F)),                     # W1
                weight_spec((1, F)),                        # b1
                weight_spec((F, F)),                        # W2
                weight_spec((1, F)),                        # b2
                weight_spec((1, F)),                        # W3 row
                pl.BlockSpec(memory_space=pltpu.MemorySpace.SMEM),  # b3 scalar
            ],
            out_specs=pl.BlockSpec((1, Bt), lambda i: (0, i)),  # lane-dense row
            scratch_shapes=[pltpu.VMEM((Bt, n_in), jnp.bfloat16)],
            compiler_params=pltpu.CompilerParams(
                dimension_semantics=("parallel",),          # v7x: 2 TCs share batch
                vmem_limit_bytes=vmem_limit),
        )(state, action, w1, b1, w2, b2, w3row, b3)

    if _WEIGHT_SINGLE_BUFFER:
        try:
            q_row = run(True)
        except Exception:   # pl.Buffered(1) unsupported here -> default buffering
            _WEIGHT_SINGLE_BUFFER = False
            q_row = run(False)
    else:
        q_row = run(False)

    # matches torch.squeeze(q): (B,), collapsing to a 0-d scalar when B == 1
    return jnp.squeeze(q_row[0, :B])


# ----------------------------------------------------------------------------
# Deterministic parameter init (Xavier uniform, same gains as the torch code)
# ----------------------------------------------------------------------------
def _xavier_uniform(key, fan_in, fan_out, gain):
    bound = gain * math.sqrt(6.0 / (fan_in + fan_out))
    # stored as (fan_in, fan_out) so the kernel computes x @ W
    return jax.random.uniform(key, (fan_in, fan_out), jnp.float32,
                              minval=-bound, maxval=bound)


def init_critic_params(key, n_input, n_features, n_output):
    k1, k2, k3 = jax.random.split(key, 3)
    gain_relu = math.sqrt(2.0)   # nn.init.calculate_gain('relu')
    gain_lin = 1.0               # nn.init.calculate_gain('linear')
    w1 = _xavier_uniform(k1, n_input, n_features, gain_relu)
    w2 = _xavier_uniform(k2, n_features, n_features, gain_relu)
    w3 = _xavier_uniform(k3, n_features, n_output, gain_lin)
    # torch default Linear bias init is uniform(-1/sqrt(fan_in)); zeros keep
    # this deterministic and do not change the forward-pass structure.
    b1 = jnp.zeros((1, n_features), jnp.float32)
    b2 = jnp.zeros((1, n_features), jnp.float32)
    b3 = jnp.zeros((1, n_output), jnp.float32)
    return (w1, b1, w2, b2, w3, b3)


# ----------------------------------------------------------------------------
# Pure-JAX f32 reference for a sanity check
# ----------------------------------------------------------------------------
def critic_ref(state, action, params):
    w1, b1, w2, b2, w3, b3 = params
    x = jnp.concatenate(
        [state.astype(jnp.float32), action.astype(jnp.float32)], axis=1)
    h1 = jax.nn.relu(x @ w1 + b1)
    h2 = jax.nn.relu(h1 @ w2 + b2)
    return jnp.squeeze(h2 @ w3 + b3)


if __name__ == "__main__":
    # Small shapes consistent with the module (humanoid-standup-ish critic).
    batch = 8
    state_dim = 24
    action_dim = 8
    n_features = 32                   # NOTE: multiples of 128 use the MXU best
    n_output = 1                      # output_shape = (1,)
    n_input = state_dim + action_dim  # input_shape[-1] after concat

    key = jax.random.PRNGKey(0)
    k_s, k_a, k_p = jax.random.split(key, 3)
    state = jax.random.normal(k_s, (batch, state_dim), jnp.float32)
    action = jax.random.normal(k_a, (batch, action_dim), jnp.float32)
    params = init_critic_params(k_p, n_input, n_features, n_output)
    prepared = prepare_params(params)        # one-time weight prep (bf16 etc.)

    q = jax.block_until_ready(critic_forward(state, action, prepared))
    q_ref = jax.block_until_ready(critic_ref(state, action, params))

    assert q.shape == (batch,), q.shape
    # bf16 matmul inputs with f32 accumulation -> loosened tolerance vs f32 ref
    assert jnp.allclose(q, q_ref, atol=5e-2, rtol=5e-2), (q, q_ref)

    print("KERNEL_OK")
</pallas_src>

<mosaic_0001>
module attributes {stable_mosaic.version = 11 : i64} {
  func.func @kernel(%arg0: i32, %arg1: memref<16x24xbf16, #tpu.memory_space<vmem>>, %arg2: memref<16x8xbf16, #tpu.memory_space<vmem>>, %arg3: memref<32x32xbf16, #tpu.memory_space<vmem>>, %arg4: memref<1x32xf32, #tpu.memory_space<vmem>>, %arg5: memref<32x32xbf16, #tpu.memory_space<vmem>>, %arg6: memref<1x32xf32, #tpu.memory_space<vmem>>, %arg7: memref<1x32xf32, #tpu.memory_space<vmem>>, %arg8: memref<1xf32, #tpu.memory_space<smem>>, %arg9: memref<1x16xf32, #tpu.memory_space<vmem>>, %arg10: memref<16x32xbf16, #tpu.memory_space<vmem>>) attributes {dimension_semantics = [#tpu.dimension_semantics<parallel>], iteration_bounds = array<i64: 1>, scalar_prefetch = 0 : i64, scratch_operands = 1 : i64, tpu.core_type = #tpu.core_type<tc>, window_params = [{transform_indices = @transform_0, window_bounds = array<i64: 16, 24>}, {transform_indices = @transform_1, window_bounds = array<i64: 16, 8>}, {pipeline_mode = #tpu.pipeline_mode<synchronous>, transform_indices = @transform_2, window_bounds = array<i64: 32, 32>}, {pipeline_mode = #tpu.pipeline_mode<synchronous>, transform_indices = @transform_3, window_bounds = array<i64: 1, 32>}, {pipeline_mode = #tpu.pipeline_mode<synchronous>, transform_indices = @transform_4, window_bounds = array<i64: 32, 32>}, {pipeline_mode = #tpu.pipeline_mode<synchronous>, transform_indices = @transform_5, window_bounds = array<i64: 1, 32>}, {pipeline_mode = #tpu.pipeline_mode<synchronous>, transform_indices = @transform_6, window_bounds = array<i64: 1, 32>}, {transform_indices = @transform_7, window_bounds = array<i64: 1>}, {transform_indices = @transform_8, window_bounds = array<i64: 1, 16>}]} {
    %c0 = arith.constant 0 : index
    %c0_0 = arith.constant 0 : index
    %0 = vector.load %arg1[%c0, %c0_0] : memref<16x24xbf16, #tpu.memory_space<vmem>>, vector<16x24xbf16>
    %c0_1 = arith.constant 0 : index
    %c0_2 = arith.constant 0 : index
    %1 = vector.load %arg10[%c0_1, %c0_2] : memref<16x32xbf16, #tpu.memory_space<vmem>>, vector<16x24xbf16>
    tpu.vector_store %arg10[%c0_1, %c0_2], %0 {strides = array<i32>} : memref<16x32xbf16, #tpu.memory_space<vmem>>, vector<16x24xbf16>,
    %c0_3 = arith.constant 0 : index
    %c0_4 = arith.constant 0 : index
    %2 = vector.load %arg2[%c0_3, %c0_4] : memref<16x8xbf16, #tpu.memory_space<vmem>>, vector<16x8xbf16>
    %c0_5 = arith.constant 0 : index
    %c24 = arith.constant 24 : index
    %3 = vector.load %arg10[%c0_5, %c24] : memref<16x32xbf16, #tpu.memory_space<vmem>>, vector<16x8xbf16>
    tpu.vector_store %arg10[%c0_5, %c24], %2 {strides = array<i32>} : memref<16x32xbf16, #tpu.memory_space<vmem>>, vector<16x8xbf16>,
    %c0_6 = arith.constant 0 : index
    %c0_7 = arith.constant 0 : index
    %4 = vector.load %arg10[%c0_6, %c0_7] : memref<16x32xbf16, #tpu.memory_space<vmem>>, vector<16x32xbf16>
    %c0_8 = arith.constant 0 : index
    %c0_9 = arith.constant 0 : index
    %5 = vector.load %arg3[%c0_8, %c0_9] : memref<32x32xbf16, #tpu.memory_space<vmem>>, vector<32x32xbf16>
    %cst = arith.constant dense<0.000000e+00> : vector<16x32xf32>
    %6 = tpu.matmul %4, %5, %cst {dimension_numbers = #tpu.dot_dimension_numbers<[1], [0], [0], [1], [0, 0, 1, 1], [], []>} : vector<16x32xbf16>, vector<32x32xbf16>, vector<16x32xf32> -> vector<16x32xf32>
    %c0_10 = arith.constant 0 : index
    %c0_11 = arith.constant 0 : index
    %7 = vector.load %arg4[%c0_10, %c0_11] : memref<1x32xf32, #tpu.memory_space<vmem>>, vector<1x32xf32>
    %8 = vector.broadcast %7 : vector<1x32xf32> to vector<16x32xf32>
    %9 = arith.addf %6, %8 : vector<16x32xf32>
    %cst_12 = arith.constant 0.000000e+00 : f32
    %10 = vector.broadcast %cst_12 : f32 to vector<16x32xf32>
    %11 = arith.maximumf %9, %10 : vector<16x32xf32>
    %12 = arith.truncf %11 : vector<16x32xf32> to vector<16x32xbf16>
    %c0_13 = arith.constant 0 : index
    %c0_14 = arith.constant 0 : index
    %13 = vector.load %arg5[%c0_13, %c0_14] : memref<32x32xbf16, #tpu.memory_space<vmem>>, vector<32x32xbf16>
    %cst_15 = arith.constant dense<0.000000e+00> : vector<16x32xf32>
    %14 = tpu.matmul %12, %13, %cst_15 {dimension_numbers = #tpu.dot_dimension_numbers<[1], [0], [0], [1], [0, 0, 1, 1], [], []>} : vector<16x32xbf16>, vector<32x32xbf16>, vector<16x32xf32> -> vector<16x32xf32>
    %c0_16 = arith.constant 0 : index
    %c0_17 = arith.constant 0 : index
    %15 = vector.load %arg6[%c0_16, %c0_17] : memref<1x32xf32, #tpu.memory_space<vmem>>, vector<1x32xf32>
    %16 = vector.broadcast %15 : vector<1x32xf32> to vector<16x32xf32>
    %17 = arith.addf %14, %16 : vector<16x32xf32>
    %cst_18 = arith.constant 0.000000e+00 : f32
    %18 = vector.broadcast %cst_18 : f32 to vector<16x32xf32>
    %19 = arith.maximumf %17, %18 : vector<16x32xf32>
    %c0_19 = arith.constant 0 : index
    %c0_20 = arith.constant 0 : index
    %20 = vector.load %arg7[%c0_19, %c0_20] : memref<1x32xf32, #tpu.memory_space<vmem>>, vector<1x32xf32>
    "tpu.trace_start"() <{level = 10 : i32, message = "of,bf->ob"}> : () -> ()
    %cst_21 = arith.constant dense<0.000000e+00> : vector<1x16xf32>
    %21 = tpu.matmul %20, %19, %cst_21 {dimension_numbers = #tpu.dot_dimension_numbers<[1], [1], [0], [0], [0, 0, 1, 0], [], []>} : vector<1x32xf32>, vector<16x32xf32>, vector<1x16xf32> -> vector<1x16xf32>
    "tpu.trace_stop"() : () -> ()
    %c0_22 = arith.constant 0 : index
    %22 = memref.load %arg8[%c0_22] : memref<1xf32, #tpu.memory_space<smem>>
    %23 = vector.broadcast %22 : f32 to vector<1x16xf32>
    %24 = arith.addf %21, %23 : vector<1x16xf32>
    %c0_23 = arith.constant 0 : index
    %c0_24 = arith.constant 0 : index
    %25 = vector.load %arg9[%c0_23, %c0_24] : memref<1x16xf32, #tpu.memory_space<vmem>>, vector<1x16xf32>
    tpu.vector_store %arg9[%c0_23, %c0_24], %24 {strides = array<i32>} : memref<1x16xf32, #tpu.memory_space<vmem>>, vector<1x16xf32>,
    return
  }
  func.func @transform_0(%arg0: i32) -> (i32, i32) {
    %c0_i32 = arith.constant 0 : i32
    %c0_i32_0 = arith.constant 0 : i32
    return %arg0, %c0_i32 : i32, i32
  }
  func.func @transform_1(%arg0: i32) -> (i32, i32) {
    %c0_i32 = arith.constant 0 : i32
    %c0_i32_0 = arith.constant 0 : i32
    return %arg0, %c0_i32 : i32, i32
  }
  func.func @transform_2(%arg0: i32) -> (i32, i32) {
    %c0_i32 = arith.constant 0 : i32
    %c0_i32_0 = arith.constant 0 : i32
    %c0_i32_1 = arith.constant 0 : i32
    return %c0_i32, %c0_i32_0 : i32, i32
  }
  func.func @transform_3(%arg0: i32) -> (i32, i32) {
    %c0_i32 = arith.constant 0 : i32
    %c0_i32_0 = arith.constant 0 : i32
    %c0_i32_1 = arith.constant 0 : i32
    return %c0_i32, %c0_i32_0 : i32, i32
  }
  func.func @transform_4(%arg0: i32) -> (i32, i32) {
    %c0_i32 = arith.constant 0 : i32
    %c0_i32_0 = arith.constant 0 : i32
    %c0_i32_1 = arith.constant 0 : i32
    return %c0_i32, %c0_i32_0 : i32, i32
  }
  func.func @transform_5(%arg0: i32) -> (i32, i32) {
    %c0_i32 = arith.constant 0 : i32
    %c0_i32_0 = arith.constant 0 : i32
    %c0_i32_1 = arith.constant 0 : i32
    return %c0_i32, %c0_i32_0 : i32, i32
  }
  func.func @transform_6(%arg0: i32) -> (i32, i32) {
    %c0_i32 = arith.constant 0 : i32
    %c0_i32_0 = arith.constant 0 : i32
    %c0_i32_1 = arith.constant 0 : i32
    return %c0_i32, %c0_i32_0 : i32, i32
  }
  func.func @transform_7(%arg0: i32) -> i32 {
    %c0_i32 = arith.constant 0 : i32
    %c0_i32_0 = arith.constant 0 : i32
    return %c0_i32 : i32
  }
  func.func @transform_8(%arg0: i32) -> (i32, i32) {
    %c0_i32 = arith.constant 0 : i32
    %c0_i32_0 = arith.constant 0 : i32
    return %c0_i32, %arg0 : i32, i32
  }
}

module attributes {stable_mosaic.version = 11 : i64} {
  func.func @kernel(%arg0: i32, %arg1: memref<16x24xbf16, #tpu.memory_space<vmem>>, %arg2: memref<16x8xbf16, #tpu.memory_space<vmem>>, %arg3: memref<32x32xbf16, #tpu.memory_space<vmem>>, %arg4: memref<1x32xf32, #tpu.memory_space<vmem>>, %arg5: memref<32x32xbf16, #tpu.memory_space<vmem>>, %arg6: memref<1x32xf32, #tpu.memory_space<vmem>>, %arg7: memref<1x32xf32, #tpu.memory_space<vmem>>, %arg8: memref<1xf32, #tpu.memory_space<smem>>, %arg9: memref<1x16xf32, #tpu.memory_space<vmem>>, %arg10: memref<16x32xbf16, #tpu.memory_space<vmem>>) attributes {dimension_semantics = [#tpu.dimension_semantics<parallel>], iteration_bounds = array<i64: 1>, scalar_prefetch = 0 : i64, scratch_operands = 1 : i64, tpu.core_type = #tpu.core_type<tc>, window_params = [{transform_indices = @transform_0, window_bounds = array<i64: 16, 24>}, {transform_indices = @transform_1, window_bounds = array<i64: 16, 8>}, {pipeline_mode = #tpu.pipeline_mode<synchronous>, transform_indices = @transform_2, window_bounds = array<i64: 32, 32>}, {pipeline_mode = #tpu.pipeline_mode<synchronous>, transform_indices = @transform_3, window_bounds = array<i64: 1, 32>}, {pipeline_mode = #tpu.pipeline_mode<synchronous>, transform_indices = @transform_4, window_bounds = array<i64: 32, 32>}, {pipeline_mode = #tpu.pipeline_mode<synchronous>, transform_indices = @transform_5, window_bounds = array<i64: 1, 32>}, {pipeline_mode = #tpu.pipeline_mode<synchronous>, transform_indices = @transform_6, window_bounds = array<i64: 1, 32>}, {transform_indices = @transform_7, window_bounds = array<i64: 1>}, {transform_indices = @transform_8, window_bounds = array<i64: 1, 16>}]} {
    %c0 = arith.constant 0 : index
    %c0_0 = arith.constant 0 : index
    %0 = vector.load %arg1[%c0, %c0_0] : memref<16x24xbf16, #tpu.memory_space<vmem>>, vector<16x24xbf16>
    %c0_1 = arith.constant 0 : index
    %c0_2 = arith.constant 0 : index
    %1 = vector.load %arg10[%c0_1, %c0_2] : memref<16x32xbf16, #tpu.memory_space<vmem>>, vector<16x24xbf16>
    tpu.vector_store %arg10[%c0_1, %c0_2], %0 {strides = array<i32>} : memref<16x32xbf16, #tpu.memory_space<vmem>>, vector<16x24xbf16>,
    %c0_3 = arith.constant 0 : index
    %c0_4 = arith.constant 0 : index
    %2 = vector.load %arg2[%c0_3, %c0_4] : memref<16x8xbf16, #tpu.memory_space<vmem>>, vector<16x8xbf16>
    %c0_5 = arith.constant 0 : index
    %c24 = arith.constant 24 : index
    %3 = vector.load %arg10[%c0_5, %c24] : memref<16x32xbf16, #tpu.memory_space<vmem>>, vector<16x8xbf16>
    tpu.vector_store %arg10[%c0_5, %c24], %2 {strides = array<i32>} : memref<16x32xbf16, #tpu.memory_space<vmem>>, vector<16x8xbf16>,
    %c0_6 = arith.constant 0 : index
    %c0_7 = arith.constant 0 : index
    %4 = vector.load %arg10[%c0_6, %c0_7] : memref<16x32xbf16, #tpu.memory_space<vmem>>, vector<16x32xbf16>
    %c0_8 = arith.constant 0 : index
    %c0_9 = arith.constant 0 : index
    %5 = vector.load %arg3[%c0_8, %c0_9] : memref<32x32xbf16, #tpu.memory_space<vmem>>, vector<32x32xbf16>
    %cst = arith.constant dense<0.000000e+00> : vector<16x32xf32>
    %6 = tpu.matmul %4, %5, %cst {dimension_numbers = #tpu.dot_dimension_numbers<[1], [0], [0], [1], [0, 0, 1, 1], [], []>} : vector<16x32xbf16>, vector<32x32xbf16>, vector<16x32xf32> -> vector<16x32xf32>
    %c0_10 = arith.constant 0 : index
    %c0_11 = arith.constant 0 : index
    %7 = vector.load %arg4[%c0_10, %c0_11] : memref<1x32xf32, #tpu.memory_space<vmem>>, vector<1x32xf32>
    %8 = vector.broadcast %7 : vector<1x32xf32> to vector<16x32xf32>
    %9 = arith.addf %6, %8 : vector<16x32xf32>
    %cst_12 = arith.constant 0.000000e+00 : f32
    %10 = vector.broadcast %cst_12 : f32 to vector<16x32xf32>
    %11 = arith.maximumf %9, %10 : vector<16x32xf32>
    %12 = arith.truncf %11 : vector<16x32xf32> to vector<16x32xbf16>
    %c0_13 = arith.constant 0 : index
    %c0_14 = arith.constant 0 : index
    %13 = vector.load %arg5[%c0_13, %c0_14] : memref<32x32xbf16, #tpu.memory_space<vmem>>, vector<32x32xbf16>
    %cst_15 = arith.constant dense<0.000000e+00> : vector<16x32xf32>
    %14 = tpu.matmul %12, %13, %cst_15 {dimension_numbers = #tpu.dot_dimension_numbers<[1], [0], [0], [1], [0, 0, 1, 1], [], []>} : vector<16x32xbf16>, vector<32x32xbf16>, vector<16x32xf32> -> vector<16x32xf32>
    %c0_16 = arith.constant 0 : index
    %c0_17 = arith.constant 0 : index
    %15 = vector.load %arg6[%c0_16, %c0_17] : memref<1x32xf32, #tpu.memory_space<vmem>>, vector<1x32xf32>
    %16 = vector.broadcast %15 : vector<1x32xf32> to vector<16x32xf32>
    %17 = arith.addf %14, %16 : vector<16x32xf32>
    %cst_18 = arith.constant 0.000000e+00 : f32
    %18 = vector.broadcast %cst_18 : f32 to vector<16x32xf32>
    %19 = arith.maximumf %17, %18 : vector<16x32xf32>
    %c0_19 = arith.constant 0 : index
    %c0_20 = arith.constant 0 : index
    %20 = vector.load %arg7[%c0_19, %c0_20] : memref<1x32xf32, #tpu.memory_space<vmem>>, vector<1x32xf32>
    "tpu.trace_start"() <{level = 10 : i32, message = "of,bf->ob"}> : () -> ()
    %cst_21 = arith.constant dense<0.000000e+00> : vector<1x16xf32>
    %21 = tpu.matmul %20, %19, %cst_21 {dimension_numbers = #tpu.dot_dimension_numbers<[1], [1], [0], [0], [0, 0, 1, 0], [], []>} : vector<1x32xf32>, vector<16x32xf32>, vector<1x16xf32> -> vector<1x16xf32>
    "tpu.trace_stop"() : () -> ()
    %c0_22 = arith.constant 0 : index
    %22 = memref.load %arg8[%c0_22] : memref<1xf32, #tpu.memory_space<smem>>
    %23 = vector.broadcast %22 : f32 to vector<1x16xf32>
    %24 = arith.addf %21, %23 : vector<1x16xf32>
    %c0_23 = arith.constant 0 : index
    %c0_24 = arith.constant 0 : index
    %25 = vector.load %arg9[%c0_23, %c0_24] : memref<1x16xf32, #tpu.memory_space<vmem>>, vector<1x16xf32>
    tpu.vector_store %arg9[%c0_23, %c0_24], %24 {strides = array<i32>} : memref<1x16xf32, #tpu.memory_space<vmem>>, vector<1x16xf32>,
    return
  }
  func.func @transform_0(%arg0: i32) -> (i32, i32) {
    %c0_i32 = arith.constant 0 : i32
    %c0_i32_0 = arith.constant 0 : i32
    return %arg0, %c0_i32 : i32, i32
  }
  func.func @transform_1(%arg0: i32) -> (i32, i32) {
    %c0_i32 = arith.constant 0 : i32
    %c0_i32_0 = arith.constant 0 : i32
    return %arg0, %c0_i32 : i32, i32
  }
  func.func @transform_2(%arg0: i32) -> (i32, i32) {
    %c0_i32 = arith.constant 0 : i32
    %c0_i32_0 = arith.constant 0 : i32
    %c0_i32_1 = arith.constant 0 : i32
    return %c0_i32, %c0_i32_0 : i32, i32
  }
  func.func @transform_3(%arg0: i32) -> (i32, i32) {
    %c0_i32 = arith.constant 0 : i32
    %c0_i32_0 = arith.constant 0 : i32
    %c0_i32_1 = arith.constant 0 : i32
    return %c0_i32, %c0_i32_0 : i32, i32
  }
  func.func @transform_4(%arg0: i32) -> (i32, i32) {
    %c0_i32 = arith.constant 0 : i32
    %c0_i32_0 = arith.constant 0 : i32
    %c0_i32_1 = arith.constant 0 : i32
    return %c0_i32, %c0_i32_0 : i32, i32
  }
  func.func @transform_5(%arg0: i32) -> (i32, i32) {
    %c0_i32 = arith.constant 0 : i32
    %c0_i32_0 = arith.constant 0 : i32
    %c0_i32_1 = arith.constant 0 : i32
    return %c0_i32, %c0_i32_0 : i32, i32
  }
  func.func @transform_6(%arg0: i32) -> (i32, i32) {
    %c0_i32 = arith.constant 0 : i32
    %c0_i32_0 = arith.constant 0 : i32
    %c0_i32_1 = arith.constant 0 : i32
    return %c0_i32, %c0_i32_0 : i32, i32
  }
  func.func @transform_7(%arg0: i32) -> i32 {
    %c0_i32 = arith.constant 0 : i32
    %c0_i32_0 = arith.constant 0 : i32
    return %c0_i32 : i32
  }
  func.func @transform_8(%arg0: i32) -> (i32, i32) {
    %c0_i32 = arith.constant 0 : i32
    %c0_i32_0 = arith.constant 0 : i32
    return %c0_i32, %arg0 : i32, i32
  }
}

</mosaic_0001>

<bundles_post_ra>
// kernel: tpu_custom_call.1
= control target key start
LH: loop header
LB: loop body
LE: loop exit
PB: predicated region body
PF: predicated region fallthrough
CT: control target
= control target key end

     0   :  { %14 = vsyncpa [#allocation5], 0  ;;  %s578_s0 = inlined_call_operand.hbm [shape: bf16[16,24], index: 0, kind: input, shape index: {}]   ;;  %s579_s1 = inlined_call_operand.vmem [shape: bf16[16,8], index: 1, kind: input, shape index: {}]   ;;  %s580_s2 = inlined_call_operand.vmem [shape: bf16[32,32], index: 2, kind: input, shape index: {}]   ;;  %s581_s3 = inlined_call_operand.vmem [shape: f32[1,32], index: 3, kind: input, shape index: {}]   ;;  %s582_s4 = inlined_call_operand.hbm [shape: bf16[32,32], index: 4, kind: input, shape index: {}]   ;;  %s583_s5 = inlined_call_operand.vmem [shape: f32[1,32], index: 5, kind: input, shape index: {}]   ;;  %s584_s6 = inlined_call_operand.vmem [shape: f32[1,32], index: 6, kind: input, shape index: {}]   ;;  %s585_s7 = inlined_call_operand.<no memory space> [shape: f32[1], index: 7, kind: input, shape index: {}]   ;;  %s586_s8 = inlined_call_operand.hbm [shape: f32[1,16], index: 8, kind: output, shape index: {}]  }
   0x1   :  { %15 = vsyncpa [#allocation8], 0 }
   0x2   :  { %16 = vsyncpa [#allocation6], 0  ;;  %s459_s27 = smov [#allocation4]   ;;  %s387_s9 = scalar_lea.hbm %s578_s0, 128 }
   0x3   :  { %s22_s28 = sshll.u32 %s459_s27, 4  ;;  %p388_p0 = scmp.ne.s32.totalorder %s578_s0, %s387_s9  ;;  %s23_s28 = int_to_ptr.vmem [resolvable:$true] %s22_s28 }
   0x4   :  { %p391_p1 = scmp.lt.u32.totalorder %s387_s9, %s578_s0 }
   0x6   :  { %p393_p2 = pnand %p391_p1, %p388_p0 }
   0x8   :  { %396 = shalt.err (!%p393_p2)
}
   0x9   :  { %s397_s14 = scalar_lea.vmem %s23_s28, 128  ;;  %p402_p4 = scmp.lt.s32.totalorder %s23_s28, %s23_s28 }
   0xa   :  { %p398_p3 = scmp.ne.s32.totalorder %s23_s28, %s397_s14  ;;  %p403_p5 = scmp.lt.s32.totalorder %s397_s14, %s397_s14 }
   0xc   :  { %p404_p6 = por %p403_p5, %p402_p4 }
   0xe   :  { %p405_p7 = pnand %p404_p6, %p398_p3 }
  0x10   :  { %408 = shalt.err (!%p405_p7)
}
  0x11   :  { %s460_s15 = smov 64   ;;  %s461_s16 = smov 4  }
  0x12   :  { %28 = dma.hbm_to_vmem [thread:$0]  %s578_s0, 128, %s23_s28, [#allocation5], %s460_s15, %s460_s15, %s461_s16  }
  0x13   :  { %s462_s19 = smov [#allocation7]   ;;  %s409_s23 = scalar_lea.hbm %s582_s4, 256 }
  0x14   :  { %s40_s20 = sshll.u32 %s462_s19, 4  ;;  %p410_p8 = scmp.ne.s32.totalorder %s582_s4, %s409_s23  ;;  %s41_s20 = int_to_ptr.vmem [resolvable:$true] %s40_s20 }
  0x15   :  { %p413_p9 = scmp.lt.u32.totalorder %s409_s23, %s582_s4 }
  0x17   :  { %p415_p10 = pnand %p413_p9, %p410_p8 }
  0x19   :  { %418 = shalt.err (!%p415_p10)
}
  0x1a   :  { %s419_s29 = scalar_lea.vmem %s41_s20, 256  ;;  %p424_p12 = scmp.lt.s32.totalorder %s41_s20, %s41_s20 }
  0x1b   :  { %p420_p11 = scmp.ne.s32.totalorder %s41_s20, %s419_s29  ;;  %p425_p13 = scmp.lt.s32.totalorder %s419_s29, %s419_s29 }
  0x1d   :  { %p426_p0 = por %p425_p13, %p424_p12 }
  0x1f   :  { %p427_p1 = pnand %p426_p0, %p420_p11 }
  0x21   :  { %430 = shalt.err (!%p427_p1)
}
  0x22   :  { %46 = dma.hbm_to_vmem [thread:$0]  %s582_s4, 256, %s41_s20, [#allocation8], %s460_s15, %s460_s15, %s461_s16  }
  0x23   :  { %453 = dma.done.wait [#allocation5], 128  }
  0x24   :  { %454 = vsyncadd [#allocation5], 4294967168 }
  0x25   :  { %455 = dma.done.wait [#allocation8], 256  }
  0x26   :  { %456 = vsyncadd [#allocation8], 4294967040  ;;  %v463_v0 = vmov 0.0   ;;  %vm464_vm0 = vmmov 0   ;;  %v381_v1 = vld [vmem:[%s579_s1] sm:$0xff]   ;;  %vm68_vm1 = vcmask 195584   ;;  %v225_v31 = vstv %s585_s7 }
  0x27   :  { %345 = vmatprep.subr.bf16.mxu0 %v463_v0  ;;  %353 = vmatprep.subr.bf16.mxu1 %v463_v0  ;;  %v382_v2 = vld [vmem:[#allocation4] sm:$0xff]   ;;  %s465_s10 = smov 24   ;;  %v383_v3 = vld [vmem:[%s580_s2] sm:$0xff]   ;;  %vm80_vm2 = vcmask 261312   ;;  %vm106_vm3 = vcmask 261120   ;;  %v385_v7 = vld [vmem:[#allocation7] sm:$0xff]  }
  0x28   :  { %349 = vmatprep.mubr.msk.bf16.mxu0 %vm464_vm0, %v463_v0  ;;  %357 = vmatprep.mubr.msk.bf16.mxu1 %vm464_vm0, %v463_v0  ;;  %69 = vst.msk [vmem:[#allocation2] sm:$0xff] %vm68_vm1, %v382_v2  ;;  %v384_v4 = vld [vmem:[%s580_s2 + $0x8] sm:$0xff]   ;;  %v386_v8 = vld [vmem:[#allocation7 + $0x8] sm:$0xff]   ;;  %v325_v9 = vld [vmem:[%s581_s3] ss:$0 sm:$0xff]  ;;  %v466_v19 = vmov 0.0|0.0  }
  0x29   :  { %77 = vrot.lane.b32.xlu0 %v381_v1, %s465_s10  ;;  %346 = vmatpush3.bf16.msra.mxu0 %v383_v3  ;;  %v329_v20 = vld [vmem:[%s583_s5] ss:$0 sm:$0xff]  ;;  %vm370_vm4 = vmpackc.low %vm106_vm3, %vm106_vm3  ;;  %s467_s18 = smov [#allocation9]   ;;  %vm305_vm5 = vcmask 122880  }
  0x2a   :  { %347 = vmatprep.subr.bf16.mxu0 %v463_v0  ;;  %354 = vmatpush3.bf16.msra.mxu1 %v385_v7  ;;  %v223_v30 = vld [vmem:[%s584_s6] sm:$0x1]  ;;  %s313_s19 = sshll.u32 %s467_s18, 4  ;;  %s314_s19 = int_to_ptr.vmem [resolvable:$true] %s313_s19 }
  0x2b   :  { %355 = vmatprep.subr.bf16.mxu1 %v463_v0  ;;  %s431_s20 = scalar_lea.vmem %s314_s19, 16  ;;  %s435_s21 = scalar_lea.vmem %s314_s19, 32 }
  0x2c   :  { %p432_p2 = scmp.ne.s32.totalorder %s314_s19, %s431_s20  ;;  %p436_p3 = scmp.lt.s32.totalorder %s314_s19, %s314_s19 }
  0x2d   :  { %348 = vmatpush3.bf16.msra.mxu0 %v384_v4  ;;  %p437_p4 = scmp.lt.s32.totalorder %s435_s21, %s431_s20 }
  0x2e   :  { %356 = vmatpush3.bf16.msra.mxu1 %v386_v8  ;;  %368 = vmatprep.subr.bf16.mxu0 %v466_v19 }
  0x2f   :  { %p438_p5 = por %p437_p4, %p436_p3 }
  0x31   :  { %p439_p6 = pnand %p438_p5, %p432_p2 }
  0x9b   :  { %v78_v5 = vpop.permute.xlu0 %77 }
  0x9c   :  { %81 = vst.msk [vmem:[#allocation2] sm:$0xff] %vm80_vm2, %v78_v5 }
  0xa3   :  { %v82_v6 = vld [vmem:[#allocation2] sm:$0xff] }
  0xa4   :  { %350 = vmatmul.mubr.msk.bf16.vlgmr.msra.gmra.mrb[0].mxu0 %vm106_vm3, %v82_v6 }
  0xa5   :  { %365 = vmatprep.mubr.msk.f32.mxu0 %vm464_vm0, %v463_v0 }
 0x177   :  { %v144_v10 = vpop.f32.mrb[0].mxu0 }
 0x178   :  { %v145_v11 = vadd.f32 %v325_v9, %v144_v10  ;;  %v351_v12 = vpop.f32.mrb[1].mxu0 }
 0x179   :  { %v147_v13 = vpop.f32.mrb[2].mxu0 }
 0x17a   :  { %v148_v14 = vadd.f32 %v325_v9, %v147_v13  ;;  %v352_v15 = vpop.f32.mrb[3].mxu0  ;;  %v151_v16 = vmax.f32 %v145_v11, 0.0 }
 0x17c   :  { %v152_v17 = vmax.f32 %v148_v14, 0.0 }
 0x17e   :  { %v153_v18 = vpack.c.bf16 %v152_v17, %v151_v16 }
 0x180   :  { %358 = vmatmul.mubr.msk.bf16.vlgmr.msra.gmra.mrb[0].mxu1 %vm106_vm3, %v153_v18 }
 0x253   :  { %v214_v21 = vpop.f32.mrb[0].mxu1 }
 0x254   :  { %v215_v22 = vadd.f32 %v329_v20, %v214_v21  ;;  %v359_v23 = vpop.f32.mrb[1].mxu1 }
 0x255   :  { %v217_v24 = vpop.f32.mrb[2].mxu1 }
 0x256   :  { %v218_v25 = vadd.f32 %v329_v20, %v217_v24  ;;  %v360_v26 = vpop.f32.mrb[3].mxu1  ;;  %v221_v27 = vmax.f32 %v215_v22, 0.0 }
 0x258   :  { %v222_v28 = vmax.f32 %v218_v25, 0.0 }
 0x25a   :  { %v369_v29 = vpack.c.bf16 %v222_v28, %v221_v27 }
 0x25c   :  { %371 = vmatpush3.bf16.xpose.msk.msra.mxu0 %vm370_vm4, %v369_v29 }
 0x263   :  { %366 = vmatmul.mubr.msk.f32.vlgmr.msra.gmra.mrb[4].mxu0 %vm106_vm3, %v223_v30 }
 0x336   :  { %v301_v32 = vpop.f32.mrb[4].mxu0 }
 0x337   :  { %v302_v33 = vadd.f32 %v301_v32, %v225_v31  ;;  %v367_v34 = vpop.f32.mrb[5].mxu0 }
 0x339   :  { %306 = vst.msk [vmem:[#allocation9] sm:$0x1] %vm305_vm5, %v302_v33 }
 0x33a   :  { %442 = shalt.err (!%p439_p6)
}
 0x33b   :  { %s443_s7 = scalar_lea.hbm %s586_s8, 16 }
 0x33c   :  { %p444_p7 = scmp.ne.s32.totalorder %s586_s8, %s443_s7  ;;  %p447_p8 = scmp.lt.u32.totalorder %s443_s7, %s586_s8 }
 0x33e   :  { %p449_p9 = pnand %p447_p8, %p444_p7 }
 0x340   :  { %452 = shalt.err (!%p449_p9)
}
 0x341   :  { %316 = dma.vmem_to_hbm [thread:$0]  %s314_s19, 16, %s586_s8, [#allocation6]  }
 0x342   :  { %457 = dma.done.wait [#allocation6], 16  }
 0x343   :  { %458 = vsyncadd [#allocation6], 4294967280 }
 0x344   :  { %320 = vsyncpa [#allocation5], 1 }
 0x345   :  { %321 = vsyncpa [#allocation8], 1 }
 0x346   :  { %322 = vsyncpa [#allocation6], 1 }

// kernel: tpu_custom_call.1
= control target key start
LH: loop header
LB: loop body
LE: loop exit
PB: predicated region body
PF: predicated region fallthrough
CT: control target
= control target key end

     0   :  { %14 = vsyncpa [#allocation5], 0  ;;  %s578_s0 = inlined_call_operand.hbm [shape: bf16[16,24], index: 0, kind: input, shape index: {}]   ;;  %s579_s1 = inlined_call_operand.vmem [shape: bf16[16,8], index: 1, kind: input, shape index: {}]   ;;  %s580_s2 = inlined_call_operand.vmem [shape: bf16[32,32], index: 2, kind: input, shape index: {}]   ;;  %s581_s3 = inlined_call_operand.vmem [shape: f32[1,32], index: 3, kind: input, shape index: {}]   ;;  %s582_s4 = inlined_call_operand.hbm [shape: bf16[32,32], index: 4, kind: input, shape index: {}]   ;;  %s583_s5 = inlined_call_operand.vmem [shape: f32[1,32], index: 5, kind: input, shape index: {}]   ;;  %s584_s6 = inlined_call_operand.vmem [shape: f32[1,32], index: 6, kind: input, shape index: {}]   ;;  %s585_s7 = inlined_call_operand.<no memory space> [shape: f32[1], index: 7, kind: input, shape index: {}]   ;;  %s586_s8 = inlined_call_operand.hbm [shape: f32[1,16], index: 8, kind: output, shape index: {}]  }
   0x1   :  { %15 = vsyncpa [#allocation8], 0 }
   0x2   :  { %16 = vsyncpa [#allocation6], 0  ;;  %s459_s27 = smov [#allocation4]   ;;  %s387_s9 = scalar_lea.hbm %s578_s0, 128 }
   0x3   :  { %s22_s28 = sshll.u32 %s459_s27, 4  ;;  %p388_p0 = scmp.ne.s32.totalorder %s578_s0, %s387_s9  ;;  %s23_s28 = int_to_ptr.vmem [resolvable:$true] %s22_s28 }
   0x4   :  { %p391_p1 = scmp.lt.u32.totalorder %s387_s9, %s578_s0 }
   0x6   :  { %p393_p2 = pnand %p391_p1, %p388_p0 }
   0x8   :  { %396 = shalt.err (!%p393_p2)
}
   0x9   :  { %s397_s14 = scalar_lea.vmem %s23_s28, 128  ;;  %p402_p4 = scmp.lt.s32.totalorder %s23_s28, %s23_s28 }
   0xa   :  { %p398_p3 = scmp.ne.s32.totalorder %s23_s28, %s397_s14  ;;  %p403_p5 = scmp.lt.s32.totalorder %s397_s14, %s397_s14 }
   0xc   :  { %p404_p6 = por %p403_p5, %p402_p4 }
   0xe   :  { %p405_p7 = pnand %p404_p6, %p398_p3 }
  0x10   :  { %408 = shalt.err (!%p405_p7)
}
  0x11   :  { %s460_s15 = smov 64   ;;  %s461_s16 = smov 4  }
  0x12   :  { %28 = dma.hbm_to_vmem [thread:$0]  %s578_s0, 128, %s23_s28, [#allocation5], %s460_s15, %s460_s15, %s461_s16  }
  0x13   :  { %s462_s19 = smov [#allocation7]   ;;  %s409_s23 = scalar_lea.hbm %s582_s4, 256 }
  0x14   :  { %s40_s20 = sshll.u32 %s462_s19, 4  ;;  %p410_p8 = scmp.ne.s32.totalorder %s582_s4, %s409_s23  ;;  %s41_s20 = int_to_ptr.vmem [resolvable:$true] %s40_s20 }
  0x15   :  { %p413_p9 = scmp.lt.u32.totalorder %s409_s23, %s582_s4 }
  0x17   :  { %p415_p10 = pnand %p413_p9, %p410_p8 }
  0x19   :  { %418 = shalt.err (!%p415_p10)
}
  0x1a   :  { %s419_s29 = scalar_lea.vmem %s41_s20, 256  ;;  %p424_p12 = scmp.lt.s32.totalorder %s41_s20, %s41_s20 }
  0x1b   :  { %p420_p11 = scmp.ne.s32.totalorder %s41_s20, %s419_s29  ;;  %p425_p13 = scmp.lt.s32.totalorder %s419_s29, %s419_s29 }
  0x1d   :  { %p426_p0 = por %p425_p13, %p424_p12 }
  0x1f   :  { %p427_p1 = pnand %p426_p0, %p420_p11 }
  0x21   :  { %430 = shalt.err (!%p427_p1)
}
  0x22   :  { %46 = dma.hbm_to_vmem [thread:$0]  %s582_s4, 256, %s41_s20, [#allocation8], %s460_s15, %s460_s15, %s461_s16  }
  0x23   :  { %453 = dma.done.wait [#allocation5], 128  }
  0x24   :  { %454 = vsyncadd [#allocation5], 4294967168 }
  0x25   :  { %455 = dma.done.wait [#allocation8], 256  }
  0x26   :  { %456 = vsyncadd [#allocation8], 4294967040  ;;  %v463_v0 = vmov 0.0   ;;  %vm464_vm0 = vmmov 0   ;;  %v381_v1 = vld [vmem:[%s579_s1] sm:$0xff]   ;;  %vm68_vm1 = vcmask 195584   ;;  %v225_v31 = vstv %s585_s7 }
  0x27   :  { %345 = vmatprep.subr.bf16.mxu0 %v463_v0  ;;  %353 = vmatprep.subr.bf16.mxu1 %v463_v0  ;;  %v382_v2 = vld [vmem:[#allocation4] sm:$0xff]   ;;  %s465_s10 = smov 24   ;;  %v383_v3 = vld [vmem:[%s580_s2] sm:$0xff]   ;;  %vm80_vm2 = vcmask 261312   ;;  %vm106_vm3 = vcmask 261120   ;;  %v385_v7 = vld [vmem:[#allocation7] sm:$0xff]  }
  0x28   :  { %349 = vmatprep.mubr.msk.bf16.mxu0 %vm464_vm0, %v463_v0  ;;  %357 = vmatprep.mubr.msk.bf16.mxu1 %vm464_vm0, %v463_v0  ;;  %69 = vst.msk [vmem:[#allocation2] sm:$0xff] %vm68_vm1, %v382_v2  ;;  %v384_v4 = vld [vmem:[%s580_s2 + $0x8] sm:$0xff]   ;;  %v386_v8 = vld [vmem:[#allocation7 + $0x8] sm:$0xff]   ;;  %v325_v9 = vld [vmem:[%s581_s3] ss:$0 sm:$0xff]  ;;  %v466_v19 = vmov 0.0|0.0  }
  0x29   :  { %77 = vrot.lane.b32.xlu0 %v381_v1, %s465_s10  ;;  %346 = vmatpush3.bf16.msra.mxu0 %v383_v3  ;;  %v329_v20 = vld [vmem:[%s583_s5] ss:$0 sm:$0xff]  ;;  %vm370_vm4 = vmpackc.low %vm106_vm3, %vm106_vm3  ;;  %s467_s18 = smov [#allocation9]   ;;  %vm305_vm5 = vcmask 122880  }
  0x2a   :  { %347 = vmatprep.subr.bf16.mxu0 %v463_v0  ;;  %354 = vmatpush3.bf16.msra.mxu1 %v385_v7  ;;  %v223_v30 = vld [vmem:[%s584_s6] sm:$0x1]  ;;  %s313_s19 = sshll.u32 %s467_s18, 4  ;;  %s314_s19 = int_to_ptr.vmem [resolvable:$true] %s313_s19 }
  0x2b   :  { %355 = vmatprep.subr.bf16.mxu1 %v463_v0  ;;  %s431_s20 = scalar_lea.vmem %s314_s19, 16  ;;  %s435_s21 = scalar_lea.vmem %s314_s19, 32 }
  0x2c   :  { %p432_p2 = scmp.ne.s32.totalorder %s314_s19, %s431_s20  ;;  %p436_p3 = scmp.lt.s32.totalorder %s314_s19, %s314_s19 }
  0x2d   :  { %348 = vmatpush3.bf16.msra.mxu0 %v384_v4  ;;  %p437_p4 = scmp.lt.s32.totalorder %s435_s21, %s431_s20 }
  0x2e   :  { %356 = vmatpush3.bf16.msra.mxu1 %v386_v8  ;;  %368 = vmatprep.subr.bf16.mxu0 %v466_v19 }
  0x2f   :  { %p438_p5 = por %p437_p4, %p436_p3 }
  0x31   :  { %p439_p6 = pnand %p438_p5, %p432_p2 }
  0x9b   :  { %v78_v5 = vpop.permute.xlu0 %77 }
  0x9c   :  { %81 = vst.msk [vmem:[#allocation2] sm:$0xff] %vm80_vm2, %v78_v5 }
  0xa3   :  { %v82_v6 = vld [vmem:[#allocation2] sm:$0xff] }
  0xa4   :  { %350 = vmatmul.mubr.msk.bf16.vlgmr.msra.gmra.mrb[0].mxu0 %vm106_vm3, %v82_v6 }
  0xa5   :  { %365 = vmatprep.mubr.msk.f32.mxu0 %vm464_vm0, %v463_v0 }
 0x177   :  { %v144_v10 = vpop.f32.mrb[0].mxu0 }
 0x178   :  { %v145_v11 = vadd.f32 %v325_v9, %v144_v10  ;;  %v351_v12 = vpop.f32.mrb[1].mxu0 }
 0x179   :  { %v147_v13 = vpop.f32.mrb[2].mxu0 }
 0x17a   :  { %v148_v14 = vadd.f32 %v325_v9, %v147_v13  ;;  %v352_v15 = vpop.f32.mrb[3].mxu0  ;;  %v151_v16 = vmax.f32 %v145_v11, 0.0 }
 0x17c   :  { %v152_v17 = vmax.f32 %v148_v14, 0.0 }
 0x17e   :  { %v153_v18 = vpack.c.bf16 %v152_v17, %v151_v16 }
 0x180   :  { %358 = vmatmul.mubr.msk.bf16.vlgmr.msra.gmra.mrb[0].mxu1 %vm106_vm3, %v153_v18 }
 0x253   :  { %v214_v21 = vpop.f32.mrb[0].mxu1 }
 0x254   :  { %v215_v22 = vadd.f32 %v329_v20, %v214_v21  ;;  %v359_v23 = vpop.f32.mrb[1].mxu1 }
 0x255   :  { %v217_v24 = vpop.f32.mrb[2].mxu1 }
 0x256   :  { %v218_v25 = vadd.f32 %v329_v20, %v217_v24  ;;  %v360_v26 = vpop.f32.mrb[3].mxu1  ;;  %v221_v27 = vmax.f32 %v215_v22, 0.0 }
 0x258   :  { %v222_v28 = vmax.f32 %v218_v25, 0.0 }
 0x25a   :  { %v369_v29 = vpack.c.bf16 %v222_v28, %v221_v27 }
 0x25c   :  { %371 = vmatpush3.bf16.xpose.msk.msra.mxu0 %vm370_vm4, %v369_v29 }
 0x263   :  { %366 = vmatmul.mubr.msk.f32.vlgmr.msra.gmra.mrb[4].mxu0 %vm106_vm3, %v223_v30 }
 0x336   :  { %v301_v32 = vpop.f32.mrb[4].mxu0 }
 0x337   :  { %v302_v33 = vadd.f32 %v301_v32, %v225_v31  ;;  %v367_v34 = vpop.f32.mrb[5].mxu0 }
 0x339   :  { %306 = vst.msk [vmem:[#allocation9] sm:$0x1] %vm305_vm5, %v302_v33 }
 0x33a   :  { %442 = shalt.err (!%p439_p6)
}
 0x33b   :  { %s443_s7 = scalar_lea.hbm %s586_s8, 16 }
 0x33c   :  { %p444_p7 = scmp.ne.s32.totalorder %s586_s8, %s443_s7  ;;  %p447_p8 = scmp.lt.u32.totalorder %s443_s7, %s586_s8 }
 0x33e   :  { %p449_p9 = pnand %p447_p8, %p444_p7 }
 0x340   :  { %452 = shalt.err (!%p449_p9)
}
 0x341   :  { %316 = dma.vmem_to_hbm [thread:$0]  %s314_s19, 16, %s586_s8, [#allocation6]  }
 0x342   :  { %457 = dma.done.wait [#allocation6], 16  }
 0x343   :  { %458 = vsyncadd [#allocation6], 4294967280 }
 0x344   :  { %320 = vsyncpa [#allocation5], 1 }
 0x345   :  { %321 = vsyncpa [#allocation8], 1 }
 0x346   :  { %322 = vsyncpa [#allocation6], 1 }

</bundles_post_ra>
